<compile_context>
chip_gen: v7x
topology: tpu7x:2x2x1
jax: 0.10.0
libtpu: 0.0.40
codegen_flags: <defaults>
</compile_context>

<pallas_src>
import jax
import jax.numpy as jnp
from jax import lax
from jax.experimental import pallas as pl
from jax.experimental.pallas import tpu as pltpu


def _round_up(x, m):
    return (x + m - 1) // m * m


def _cdiv(a, b):
    return -(-a // b)


def _binary_matmul_kernel(w_ref, a_ref, p_ref, o_ref):
    """One (batch, spatial-tile) grid step.

    w_ref : (C_out_pad, K_pad)   compute dtype   sign(W), alpha factored out (constant block)
    a_ref : (C_out_pad, 1)       f32             per-output-channel mean(|W|)  (constant block)
    p_ref : (K_pad, S_tile)      compute dtype   im2col patches, lane-dense spatial
    o_ref : (C_out_pad, S_tile)  out dtype       lane-dense output tile (already NCHW layout)
    """
    acc = jnp.dot(w_ref[...], p_ref[...], preferred_element_type=jnp.float32)
    o_ref[...] = (acc * a_ref[...]).astype(o_ref.dtype)


def _vmem_budget_bytes():
    """~75% of physical VMEM (v5e/v6e: 128 MiB -> 96 MiB; v7x: 64 MiB -> 48 MiB)."""
    try:
        cap = pltpu.get_tpu_info().vmem_capacity_bytes
    except Exception:
        cap = 64 * 1024 * 1024  # conservative (v7x-sized) fallback
    return min(int(cap * 0.75), 100 * 1024 * 1024)


def _pick_spatial_tile(s_len, k_pad, c_out_pad, in_bytes, out_bytes, vmem_budget):
    """Largest multiple of 128 lanes whose double-buffered working set fits the budget."""
    per_lane = 2 * (k_pad * in_bytes + c_out_pad * out_bytes)          # in + out tiles, x2 buffers
    const = 2 * (c_out_pad * k_pad * in_bytes + c_out_pad * 128 * 4)   # weight + alpha blocks
    avail = max(int(vmem_budget * 0.8) - const, per_lane * 128)
    st = (avail // per_lane // 128) * 128
    st = max(st, 128)
    st = min(st, _round_up(s_len, 128))
    return st


def binary_conv(x_nchw, weight_oihw, *, stride=(1, 1), padding=(0, 0),
                compute_dtype=jnp.bfloat16, spatial_tile=None):
    """BinaryConv.forward. x: (N,C,H,W); weight: (O,I,KH,KW); returns (N,O,H_out,W_out).

    compute_dtype=bf16 is the MXU-native path (sign(W) is exact in bf16; only the
    activations are rounded).  Pass compute_dtype=jnp.float32 for full-fidelity inputs
    at reduced MXU throughput.
    """
    if isinstance(stride, int):
        stride = (stride, stride)
    if isinstance(padding, int):
        padding = (padding, padding)
    n, c_in, h, w = x_nchw.shape
    c_out, c_in_w, kh, kw = weight_oihw.shape
    assert c_in == c_in_w
    sh, sw = stride
    ph, pw = padding
    h_out = (h + 2 * ph - kh) // sh + 1
    w_out = (w + 2 * pw - kw) // sw + 1
    s_len = h_out * w_out
    k = c_in * kh * kw
    out_dtype = x_nchw.dtype

    # ---- hoisted BWN binarization: once, in f32, outside the grid -------------------
    # alpha = mean(|W|) over (I,KH,KW) per output channel (== the chained PyTorch means);
    # the MXU sees sign(W) and alpha scales the f32 accumulator afterwards (exact).
    w_f32 = weight_oihw.astype(jnp.float32)
    alpha = jnp.mean(jnp.abs(w_f32), axis=(1, 2, 3)).reshape(c_out, 1)        # (C_out, 1) f32
    sign_w = jnp.sign(w_f32).reshape(c_out, k)                                # (C_out, K) f32

    # ---- padding for unmasked layouts -----------------------------------------------
    in_bytes = jnp.dtype(compute_dtype).itemsize
    out_bytes = jnp.dtype(out_dtype).itemsize
    k_pad = _round_up(k, max(8, 32 // in_bytes))          # contraction dim: sublane packing
    c_out_pad = _round_up(c_out, max(8, 32 // out_bytes))  # output sublane group / matmul M

    # ---- wrapper-side im2col (layout plumbing, not compute): lane-dense patches -----
    # Output feature ordering of conv_general_dilated_patches is channel-major
    # (c*KH*KW + ki*KW + kj), which matches weight.reshape(O, I*KH*KW) above.
    # TODO(synk): for very large activations, an in-kernel halo'd row-window im2col
    # (manual DMA + scratch taps) would avoid the KH*KW x activation HBM traffic.
    x_c = x_nchw.astype(compute_dtype)
    patches = lax.conv_general_dilated_patches(
        x_c, (kh, kw), (sh, sw), [(ph, ph), (pw, pw)])                        # (N, K, H', W')
    patches = patches.reshape(n, k, s_len)

    # ---- VMEM-aware spatial tiling ---------------------------------------------------
    vmem_budget = _vmem_budget_bytes()
    st = spatial_tile if spatial_tile is not None else _pick_spatial_tile(
        s_len, k_pad, c_out_pad, in_bytes, out_bytes, vmem_budget)
    st = max(128, (st // 128) * 128)
    s_pad = _round_up(s_len, st)
    num_tiles = s_pad // st
    # v7x megacore: expose >= 2 parallel grid steps when possible.
    if n * num_tiles < 2 and s_pad >= 256:
        st = _round_up(_cdiv(s_pad, 2), 128)
        s_pad = 2 * st
        num_tiles = 2

    sign_w_p = jnp.pad(sign_w, ((0, c_out_pad - c_out), (0, k_pad - k))).astype(compute_dtype)
    alpha_p = jnp.pad(alpha, ((0, c_out_pad - c_out), (0, 0)))
    patches_p = jnp.pad(patches, ((0, 0), (0, k_pad - k), (0, s_pad - s_len)))

    # TODO(synk): for very large C_in*KH*KW, add a K grid axis ("arbitrary") with an f32
    # VMEM accumulator instead of a single resident K block.
    cost = pl.CostEstimate(
        flops=2 * n * c_out_pad * k_pad * s_pad,
        transcendentals=0,
        bytes_accessed=(patches_p.size * in_bytes + sign_w_p.size * in_bytes
                        + n * c_out_pad * s_pad * out_bytes))

    out_flat = pl.pallas_call(
        _binary_matmul_kernel,
        out_shape=jax.ShapeDtypeStruct((n, c_out_pad, s_pad), out_dtype),
        grid=(n, num_tiles),
        in_specs=[
            # Constant index_map -> weight / alpha blocks stay resident across the grid.
            pl.BlockSpec((c_out_pad, k_pad), lambda b, s: (0, 0)),
            pl.BlockSpec((c_out_pad, 1), lambda b, s: (0, 0)),
            pl.BlockSpec((None, k_pad, st), lambda b, s: (b, 0, s)),
        ],
        out_specs=pl.BlockSpec((None, c_out_pad, st), lambda b, s: (b, 0, s)),
        compiler_params=pltpu.CompilerParams(
            dimension_semantics=("parallel", "parallel"),
            vmem_limit_bytes=vmem_budget),
        cost_estimate=cost,
    )(sign_w_p, alpha_p, patches_p)

    # Slice off channel/spatial padding; already NCHW, no transpose needed.
    return out_flat[:, :c_out, :s_len].reshape(n, c_out, h_out, w_out)


def binary_conv_ref(x_nchw, weight_oihw, *, stride=(1, 1), padding=(0, 0)):
    """Pure-JAX reference mirroring the PyTorch module (full f32 precision)."""
    a = jnp.mean(jnp.abs(weight_oihw), axis=(1, 2, 3), keepdims=True)
    bw = jnp.sign(weight_oihw) * a
    return lax.conv_general_dilated(
        x_nchw, bw,
        window_strides=stride,
        padding=[(padding[0], padding[0]), (padding[1], padding[1])],
        dimension_numbers=("NCHW", "OIHW", "NCHW"),
        precision=lax.Precision.HIGHEST)


if __name__ == "__main__":
    # BinaryConv(in_channels=4, out_channels=8, kernel_size=3, stride=1, padding=1)
    in_channels, out_channels, kernel_size = 4, 8, 3
    stride, padding = (1, 1), (1, 1)

    key = jax.random.PRNGKey(0)
    kx, kwgt = jax.random.split(key)

    # Input (N, C, H, W) = (2, 4, 16, 16).  Default compute path feeds the MXU in bf16
    # (f32 accumulation), so use bf16-representable test values to keep the comparison
    # against the exact f32 reference tight (accumulation-order differences only).
    x = jax.random.normal(kx, (2, in_channels, 16, 16), dtype=jnp.float32)
    x = x.astype(jnp.bfloat16).astype(jnp.float32)

    # Deterministic weight init mimicking _ConvNd.reset_parameters
    # (kaiming_uniform with a=sqrt(5) -> U(-1/sqrt(fan_in), 1/sqrt(fan_in))).
    fan_in = in_channels * kernel_size * kernel_size
    bound = 1.0 / float(jnp.sqrt(jnp.float32(fan_in)))
    weight = jax.random.uniform(
        kwgt, (out_channels, in_channels, kernel_size, kernel_size),
        dtype=jnp.float32, minval=-bound, maxval=bound)

    out = jax.block_until_ready(binary_conv(x, weight, stride=stride, padding=padding))
    ref = jax.block_until_ready(binary_conv_ref(x, weight, stride=stride, padding=padding))

    assert out.shape == ref.shape == (2, out_channels, 16, 16), out.shape
    max_err = float(jnp.max(jnp.abs(out - ref)))
    assert jnp.allclose(out, ref, atol=1e-4, rtol=1e-4), max_err

    print("KERNEL_OK")
</pallas_src>

<mosaic_0001>
module attributes {stable_mosaic.version = 11 : i64} {
  func.func @_binary_matmul_kernel(%arg0: i32, %arg1: i32, %arg2: memref<8x48xbf16, #tpu.memory_space<vmem>>, %arg3: memref<8x1xf32, #tpu.memory_space<vmem>>, %arg4: memref<1x48x256xbf16, #tpu.memory_space<vmem>>, %arg5: memref<1x8x256xf32, #tpu.memory_space<vmem>>) attributes {dimension_semantics = [#tpu.dimension_semantics<parallel>, #tpu.dimension_semantics<parallel>], iteration_bounds = array<i64: 2, 1>, scalar_prefetch = 0 : i64, scratch_operands = 0 : i64, tpu.core_type = #tpu.core_type<tc>, window_params = [{pipeline_mode = #tpu.pipeline_mode<synchronous>, transform_indices = @transform_0, window_bounds = array<i64: 8, 48>}, {pipeline_mode = #tpu.pipeline_mode<synchronous>, transform_indices = @transform_1, window_bounds = array<i64: 8, 1>}, {transform_indices = @transform_2, window_bounds = array<i64: 1, 48, 256>}, {transform_indices = @transform_3, window_bounds = array<i64: 1, 8, 256>}]} {
    %c0 = arith.constant 0 : index
    %c0_0 = arith.constant 0 : index
    %0 = vector.load %arg2[%c0, %c0_0] : memref<8x48xbf16, #tpu.memory_space<vmem>>, vector<8x48xbf16>
    %c0_1 = arith.constant 0 : index
    %c0_2 = arith.constant 0 : index
    %c0_3 = arith.constant 0 : index
    %1 = vector.load %arg4[%c0_1, %c0_2, %c0_3] : memref<1x48x256xbf16, #tpu.memory_space<vmem>>, vector<1x48x256xbf16>
    %2 = vector.shape_cast %1 : vector<1x48x256xbf16> to vector<48x256xbf16>
    %cst = arith.constant dense<0.000000e+00> : vector<8x256xf32>
    %3 = tpu.matmul %0, %2, %cst {dimension_numbers = #tpu.dot_dimension_numbers<[1], [0], [0], [1], [0, 0, 1, 1], [], []>} : vector<8x48xbf16>, vector<48x256xbf16>, vector<8x256xf32> -> vector<8x256xf32>
    %c0_4 = arith.constant 0 : index
    %c0_5 = arith.constant 0 : index
    %4 = vector.load %arg3[%c0_4, %c0_5] : memref<8x1xf32, #tpu.memory_space<vmem>>, vector<8x1xf32>
    %5 = vector.broadcast %4 : vector<8x1xf32> to vector<8x256xf32>
    %6 = arith.mulf %3, %5 : vector<8x256xf32>
    %c0_6 = arith.constant 0 : index
    %c0_7 = arith.constant 0 : index
    %c0_8 = arith.constant 0 : index
    %7 = vector.load %arg5[%c0_6, %c0_7, %c0_8] : memref<1x8x256xf32, #tpu.memory_space<vmem>>, vector<1x8x256xf32>
    %8 = vector.shape_cast %7 : vector<1x8x256xf32> to vector<8x256xf32>
    %9 = vector.shape_cast %6 : vector<8x256xf32> to vector<1x8x256xf32>
    tpu.vector_store %arg5[%c0_6, %c0_7, %c0_8], %9 {strides = array<i32>} : memref<1x8x256xf32, #tpu.memory_space<vmem>>, vector<1x8x256xf32>,
    return
  }
  func.func @transform_0(%arg0: i32, %arg1: i32) -> (i32, i32) {
    %c0_i32 = arith.constant 0 : i32
    %c0_i32_0 = arith.constant 0 : i32
    %c0_i32_1 = arith.constant 0 : i32
    return %c0_i32, %c0_i32_0 : i32, i32
  }
  func.func @transform_1(%arg0: i32, %arg1: i32) -> (i32, i32) {
    %c0_i32 = arith.constant 0 : i32
    %c0_i32_0 = arith.constant 0 : i32
    %c0_i32_1 = arith.constant 0 : i32
    return %c0_i32, %c0_i32_0 : i32, i32
  }
  func.func @transform_2(%arg0: i32, %arg1: i32) -> (i32, i32, i32) {
    %c0_i32 = arith.constant 0 : i32
    %c0_i32_0 = arith.constant 0 : i32
    return %arg0, %c0_i32, %arg1 : i32, i32, i32
  }
  func.func @transform_3(%arg0: i32, %arg1: i32) -> (i32, i32, i32) {
    %c0_i32 = arith.constant 0 : i32
    %c0_i32_0 = arith.constant 0 : i32
    return %arg0, %c0_i32, %arg1 : i32, i32, i32
  }
}

</mosaic_0001>

<bundles_post_ra>
// kernel: tpu_custom_call.1
= control target key start
LH: loop header
LB: loop body
LE: loop exit
PB: predicated region body
PF: predicated region fallthrough
CT: control target
= control target key end

     0   :  { %8 = vsyncpa [#allocation3], 0  ;;  %s820_s0 = inlined_call_operand.vmem [shape: bf16[8,48], index: 0, kind: input, shape index: {}]   ;;  %s821_s1 = inlined_call_operand.vmem [shape: f32[8,1], index: 1, kind: input, shape index: {}]   ;;  %s822_s2 = inlined_call_operand.hbm [shape: bf16[2,48,256], index: 2, kind: input, shape index: {}]   ;;  %s823_s3 = inlined_call_operand.hbm [shape: f32[2,8,256], index: 3, kind: output, shape index: {}]  }
   0x1   :  { %10 = vsyncpa [#allocation3 + $0x1], 0 }
   0x2   :  { %11 = vsyncpa [#allocation4], 0 }
   0x3   :  { %13 = vsyncpa [#allocation4 + $0x1], 0  ;;  %s640_s12 = smov 0   ;;  %s642_s13 = smov 0  }
   0x4   :  { %s644_s14 = smov 0   ;;  %s646_s15 = smov 0  }
   0x5   :  { %s648_s16 = smov 0   ;;  %s650_s17 = smov 0  }
   0x6 LB: > { %s403_s18 = sadd.s32 4294967295, %s613_s17   ;;  %s404_s19 = sadd.s32 4294967294, %s613_s17   ;;  %s613_s17 = sphi %s650_s17, %s19_s17   ;;  %s609_s16 = sphi %s648_s16, %s838_s16   ;;  %s605_s15 = sphi %s646_s15, %s837_s15   ;;  %s601_s14 = sphi %s644_s14, %s836_s14   ;;  %s597_s13 = sphi %s642_s13, %s835_s13   ;;  %s593_s12 = sphi %s640_s12, %s834_s12  }
   0x7   : > { %s31_s20 = sadd.s32 1, %s609_s16  ;;  %s82_s21 = sadd.s32 1, %s601_s14 }
   0x8   : > { %p33_p0 = scmp.ge.s32.totalorder %s31_s20, 2  ;;  %p89_p1 = scmp.ne.s32.totalorder %s601_s14, %s597_s13 }
   0x9   : > { %p90_p2 = scmp.eq.s32.totalorder %s613_s17, 0  ;;  %p95_p3 = scmp.ne.s32.totalorder %s597_s13, %s593_s12 }
   0xa   : > { %s840_s20 = smov (%p33_p0, %s31_s20), 0  ;;  %p96_p5 = scmp.eq.s32.totalorder %s403_s18, 0 }
   0xb   : > { %p681_p4 = por %p90_p2, %p89_p1  ;;  %s77_s23 = ssub.s32 %s609_s16, %s840_s20 }
   0xc   : > { %p121_p6 = scmp.eq.s32.totalorder %s403_s18, 1  ;;  %p80_p7 = scmp.eq.s32.totalorder %s77_s23, 0 }
   0xd   : > { %p687_p8 = por %p96_p5, %p95_p3  ;;  %p127_p10 = scmp.eq.s32.totalorder %s404_s19, 1 }
   0xe   : > { %p691_p9 = por %p121_p6, %p89_p1  ;;  %p438_p13 = scmp.lt.s32.totalorder %s613_s17, 2 }
   0xf   : > { %s696_s26 = scalar_select %p80_p7, %s601_s14, %s82_s21  }
  0x10   : > { %s827_s25 = scalar_select %p691_p9, 1, 0 }
  0x11   : > { %p698_p11 = por %p127_p10, %p95_p3  ;;  %s153_s28 = sand.u32 1, %s601_s14  }
  0x12   : > { %s423_s29 = smul.u32 48, %s153_s28  ;;  %p708_p0 = pnand %p438_p13, %p681_p4 }
  0x13   : > { %s828_s27 = scalar_select %p698_p11, 1, 0 }
  0x14   : > { %s424_s30 = smul.u32 768, %s609_s16  ;;  %s157_s8 = scalar_lea.vmem [#allocation2], %s423_s29 }
  0x15   : > { %s166_s9 = sshll.u32 %s157_s8, 4  ;;  %s720_s10 = scalar_lea.sflag [#allocation3], %s153_s28  ;;  %s717_s9 = int_to_ptr.vmem [resolvable:$true] %s166_s9 }
  0x16   : > { %s715_s7 = scalar_lea.hbm %s822_s2, %s424_s30  ;;  %p503_p3 = pneg %p708_p0 }
  0x17   : > { %s501_s11 = scalar_lea.hbm %s715_s7, 768  ;;  %s506_s21 = scalar_lea.hbm %s822_s2, 1536 }
  0x18   : > { %p502_p2 = scmp.ne.s32.totalorder %s715_s7, %s501_s11  ;;  %p507_p6 = scmp.lt.u32.totalorder %s715_s7, %s822_s2 }
  0x19   : > { %p508_p7 = scmp.lt.u32.totalorder %s506_s21, %s501_s11  ;;  %p510_p13 = scmp.lt.u32.totalorder %s501_s11, %s715_s7 }
  0x1a   : > { %p504_p4 = pnand %p503_p3, %p502_p2 }
  0x1b   : > { %p509_p10 = por %p508_p7, %p507_p6 }
  0x1c   : > { %p505_p5 = pneg %p504_p4 }
  0x1d   : > { %p511_p12 = por %p510_p13, %p509_p10 }
  0x1f   : > { %p512_p1 = pnand %p511_p12, %p505_p5 }
  0x21   : > { %515 = shalt.err (!%p512_p1)
}
  0x22   : > { %s516_s28 = scalar_lea.vmem %s717_s9, 768  ;;  %s615_s29 = smov [#allocation2]  }
  0x23   : > { %p517_p2 = scmp.ne.s32.totalorder %s717_s9, %s516_s28  ;;  %s521_s30 = sshll.u32 %s615_s29, 4  ;;  %s522_s30 = int_to_ptr.vmem [resolvable:$false] %s521_s30 }
  0x24   : > { %s523_s5 = scalar_lea.vmem %s522_s30, 1536  ;;  %p524_p9 = scmp.lt.s32.totalorder %s717_s9, %s522_s30 }
  0x25   : > { %p519_p4 = pnand %p517_p2, %p503_p3  ;;  %p525_p6 = scmp.lt.s32.totalorder %s523_s5, %s516_s28 }
  0x27   : > { %p520_p11 = pneg %p519_p4  ;;  %p526_p7 = por %p525_p6, %p524_p9 }
  0x29   : > { %p527_p10 = pnand %p526_p7, %p520_p11 }
  0x2b   : > { %530 = shalt.err (!%p527_p10)
}
  0x2c   : > { %s616_s6 = smov 128   ;;  %s617_s8 = smov 8  }
  0x2d   : > { %433 = dma.hbm_to_vmem [thread:$0]  (!%p708_p0), %s715_s7, 768, %s717_s9, %s720_s10, %s616_s6, %s616_s6, %s617_s8  }
  0x2e   : > { %p174_p12 = scmp.lt.s32.totalorder %s613_s17, 3  ;;  %p830_p1 = scmp.ge.s32.totalorder %s613_s17, 1 }
  0x30   : > { %p175_p3 = pnand %p830_p1, %p174_p12 }
  0x31   : > { %s752_s11 = sand.u32 (!%p175_p3), 1, %s597_s13  }
  0x32   : > { %178 = sbr.rel (%p175_p3) target bundleno = 301 (0x12d), region = 32  ;;  %s181_s19 = scalar_lea.sflag (!%p175_p3), [#allocation3], %s752_s11 }
  0x33   : > { %s425_s18 = smul.u32 (!%p175_p3), 48, %s752_s11 }
  0x35   : > { %s184_s21 = scalar_lea.vmem (!%p175_p3), [#allocation2], %s425_s18 }
  0x39   : > { %584 = dma.done.wait (%p687_p8), %s181_s19, 768  }
  0x3a   : > { %586 = vsyncadd (%p687_p8), %s181_s19, 4294966528  ;;  %v618_v0 = vmov 0   ;;  %v492_v1 = vld [vmem:[%s184_s21 + $0x4] ss:$8 sps:$4 sm:$0xff]   ;;  %v494_v2 = vld [vmem:[%s184_s21] ss:$8 sps:$4 sm:$0xff]  }
  0x3b   : > { %283 = vmatprep.mubr.bf16.mxu0 %v618_v0  ;;  %491 = vset.pattern.permute.xlu0 %v618_v0  ;;  %v495_v3 = vld [vmem:[%s184_s21 + $0x14] ss:$8 sps:$4 sm:$0xff]   ;;  %v497_v4 = vld [vmem:[%s184_s21 + $0x10] ss:$8 sps:$4 sm:$0xff]   ;;  %v498_v5 = vld [vmem:[%s184_s21 + $0x24] ss:$8 sps:$4 sm:$0xff]  }
  0x3c   : > { %251 = vmatprep.subr.bf16.mxu0 %v492_v1  ;;  %v292_v6 = vld [vmem:[%s821_s1] sm:$0xff]  ;;  %vm247_vm0 = vcmask 392192   ;;  %s409_s10 = sshll.u32 %s752_s11, 4  ;;  %s422_s22 = sshll.u32 %s605_s15, 8 }
  0x3d   : > { %252 = vmatpush1.bf16.msra.mxu0 %v494_v2  ;;  %295 = vperm.xlu0 %491, %v292_v6   ;;  %v500_v7 = vld [vmem:[%s184_s21 + $0x20] ss:$8 sps:$4 sm:$0xff]   ;;  %s206_s23 = scalar_lea.vmem [#allocation5], %s409_s10  ;;  %s771_s5 = scalar_lea.hbm %s823_s3, %s422_s22 }
  0x3e   : > { %253 = vmatprep.subr.bf16.mxu0 %v495_v3  ;;  %v210_v8 = vld [vmem:[%s820_s0] sm:$0xf]  ;;  %s319_s28 = sshll.u32 %s206_s23, 4  ;;  %s303_s15 = scalar_lea.sflag [#allocation4], %s752_s11  ;;  %s773_s28 = int_to_ptr.vmem [resolvable:$true] %s319_s28 }
  0x3f   : > { %s531_s6 = scalar_lea.vmem %s773_s28, 256  ;;  %p831_p9 = scmp.ne.s32.totalorder %s827_s25, 0 }
  0x40   : > { %p532_p8 = scmp.ne.s32.totalorder %s773_s28, %s531_s6  ;;  %s619_s8 = smov [#allocation5]  }
  0x41   : > { %254 = vmatpush1.bf16.msra.mxu0 %v497_v4  ;;  %s535_s18 = sshll.u32 %s619_s8, 4  ;;  %s536_s18 = int_to_ptr.vmem [resolvable:$false] %s535_s18 }
  0x42   : > { %255 = vmatprep.subr.bf16.mxu0 %v498_v5  ;;  %p533_p11 = pnand %p532_p8, %p831_p9  ;;  %s537_s19 = scalar_lea.vmem %s536_s18, 512 }
  0x43   : > { %p538_p5 = scmp.lt.s32.totalorder %s773_s28, %s536_s18  ;;  %p539_p13 = scmp.lt.s32.totalorder %s537_s19, %s531_s6 }
  0x44   : > { %p534_p0 = pneg %p533_p11 }
  0x45   : > { %256 = vmatpush1.bf16.msra.mxu0 %v500_v7  ;;  %p540_p2 = por %p539_p13, %p538_p5 }
  0x47   : > { %p541_p4 = pnand %p540_p2, %p534_p0 }
  0x48   : > { %416 = vmatmul.mubr.msk.bf16.vlgmr.msra.gmra.mrb[0].mxu0 %vm247_vm0, %v210_v8 }
  0xbc   : > { %v296_v9 = vpop.permute.xlu0 %295 }
 0x11b   : > { %v285_v10 = vpop.f32.mrb[0].mxu0 }
 0x11c   : > { %v298_v11 = vmul.f32 %v296_v9, %v285_v10  ;;  %v287_v12 = vpop.f32.mrb[1].mxu0 }
 0x11d   : > { %v299_v13 = vmul.f32 %v296_v9, %v287_v12  ;;  %v289_v14 = vpop.f32.mrb[2].mxu0 }
 0x11e   : > { %300 = vst [vmem:[%s206_s23] sm:$0xff] %v298_v11  ;;  %v290_v15 = vpop.f32.mrb[3].mxu0 }
 0x11f   : > { %301 = vst [vmem:[%s206_s23 + $0x8] sm:$0xff] %v299_v13 }
 0x120   : > { %544 = shalt.err (!%p541_p4)
}
 0x121   : > { %s545_s11 = scalar_lea.hbm %s771_s5, 256  ;;  %s549_s7 = scalar_lea.hbm %s823_s3, 512 }
 0x122   : > { %p546_p6 = scmp.ne.s32.totalorder %s771_s5, %s545_s11  ;;  %p550_p12 = scmp.lt.u32.totalorder %s771_s5, %s823_s3 }
 0x123   : > { %p551_p1 = scmp.lt.u32.totalorder %s549_s7, %s545_s11  ;;  %p553_p8 = scmp.lt.u32.totalorder %s545_s11, %s771_s5 }
 0x124   : > { %p547_p7 = pnand %p546_p6, %p831_p9 }
 0x125   : > { %p552_p3 = por %p551_p1, %p550_p12 }
 0x126   : > { %p548_p10 = pneg %p547_p7 }
 0x127   : > { %p554_p11 = por %p553_p8, %p552_p3 }
 0x129   : > { %p555_p0 = pnand %p554_p11, %p548_p10 }
 0x12b   : > { %558 = shalt.err (!%p555_p0)
}
 0x12c   : > { %428 = dma.vmem_to_hbm [thread:$0]  (%p831_p9), %s773_s28, 256, %s771_s5, %s303_s15  }
 0x12d PF: > { %s331_s10 = sand.u32 1, %s593_s12   ;;  %p832_p5 = scmp.ne.s32.totalorder %s828_s27, 0 }
 0x12e   : > { %p833_p13 = scmp.ge.s32.totalorder %s613_s17, 2  ;;  %s332_s22 = scalar_lea.sflag [#allocation4], %s331_s10 }
 0x130   : > { %p435_p2 = pnand %p833_p13, %p832_p5 }
 0x132   : > { %588 = dma.done.wait (!%p435_p2), %s332_s22, 256  }
 0x133   : > { %590 = vsyncadd (!%p435_p2), %s332_s22, 4294967040  ;;  %s19_s17 = sadd.s32 1, %s613_s17   ;;  %s834_s12 = smov %s597_s13 }
 0x134   : > { %p16_p4 = scmp.ge.s32.totalorder %s19_s17, 4   ;;  %s835_s13 = smov %s601_s14 }
 0x135   : > { %s836_s14 = smov %s696_s26  ;;  %s837_s15 = smov %s609_s16 }
 0x136   : > { %s838_s16 = smov %s840_s20  ;;  %18 = sbr.rel (!%p16_p4) target bundleno = 6 (0x6), region = 77 }
 0x13d   :  { %337 = vsyncpa [#allocation3], 1 }
 0x13e   :  { %339 = vsyncpa [#allocation3 + $0x1], 1 }
 0x13f   :  { %340 = vsyncpa [#allocation4], 1 }
 0x140   :  { %342 = vsyncpa [#allocation4 + $0x1], 1 }

</bundles_post_ra>
